<compile_context>
chip_gen: v7x
topology: tpu7x:2x2x1
jax: 0.10.0
libtpu: 0.0.40
codegen_flags: <defaults>
</compile_context>

<pallas_src>
import math

import jax
import jax.numpy as jnp
from jax.experimental import pallas as pl
from jax.experimental.pallas import tpu as pltpu


# ---------------------------------------------------------------------------
# PE table (the analog of the PyTorch __init__ buffer) — plain JAX, one-time.
# ---------------------------------------------------------------------------
def _build_pe(seq_len, d_model):
    """Sinusoidal table (seq_len, d_model), float32 — matches PyTorch exactly."""
    assert d_model % 2 == 0, "d_model must be even (matches the PyTorch module)"
    position = jnp.arange(seq_len, dtype=jnp.float32)[:, None]            # (S, 1)
    inv_freq = jnp.exp(jnp.arange(0, d_model, 2, dtype=jnp.float32)
                       * (-(math.log(10000.0) / d_model)))                # (D/2,)
    angle = position * inv_freq                                           # (S, D/2)
    # interleave: column 2i -> sin, column 2i+1 -> cos
    pe = jnp.stack([jnp.sin(angle), jnp.cos(angle)], axis=-1)             # (S, D/2, 2)
    return pe.reshape(seq_len, d_model)


# ---------------------------------------------------------------------------
# Kernel: pure memory-bound add.
# ---------------------------------------------------------------------------
def _add_pe_kernel(x_ref, pe_ref, o_ref):
    # x_ref / o_ref: (bt, lt) block of the flattened (B, S*D) input.
    # pe_ref:        (1, lt)  block of the flattened PE row (f32, VMEM-resident
    #                across the inner batch axis) — broadcasts over sublanes.
    x = x_ref[...].astype(jnp.float32)
    o_ref[...] = (x + pe_ref[...]).astype(o_ref.dtype)


# ---------------------------------------------------------------------------
# Tile selection (trace-time Python).
# ---------------------------------------------------------------------------
_LANE_TILE_MAX = 32 * 1024        # elements along the flattened S*D axis per block
_ROW_BLOCK_BYTES = 1 << 20        # ~1 MiB x-block target


def _pick_lane_tile(length):
    """Largest multiple of 128 that divides `length` and is <= _LANE_TILE_MAX,
    else the full extent (full-extent blocks are always legal)."""
    if length <= _LANE_TILE_MAX:
        return length
    if length % 128 != 0:
        return length
    t = (_LANE_TILE_MAX // 128) * 128
    while t >= 128 and length % t != 0:
        t -= 128
    return t if t >= 128 else length


def _pick_batch_tile(batch, lane_tile, itemsize):
    """Multiple of 8 that divides `batch`, sized so the x block is ~1 MiB;
    falls back to the full batch when batch is small / not 8-aligned."""
    if batch <= 8 or batch % 8 != 0:
        return batch
    rows = max(8, _ROW_BLOCK_BYTES // max(1, lane_tile * itemsize))
    bt = min(batch, (rows // 8) * 8)
    while batch % bt != 0:        # terminates at 8 since batch % 8 == 0
        bt -= 8
    return bt


# ---------------------------------------------------------------------------
# Wrapper.
# ---------------------------------------------------------------------------
def positional_encoding(x):
    """x: (B, S, D) float array. Returns x + sinusoidal PE, same shape, dtype of x."""
    B, S, D = x.shape
    pe = _build_pe(S, D)                       # (S, D) f32, computed once per call
    L = S * D
    x2 = x.reshape(B, L)                       # lane-dense view
    pe2 = pe.reshape(1, L)

    lt = _pick_lane_tile(L)
    bt = _pick_batch_tile(B, lt, x.dtype.itemsize)
    n_c = L // lt
    n_b = B // bt

    out = pl.pallas_call(
        _add_pe_kernel,
        out_shape=jax.ShapeDtypeStruct((B, L), x.dtype),
        grid=(n_c, n_b),                       # column axis OUTER -> pe block resident
        in_specs=[
            pl.BlockSpec((bt, lt), lambda c, b: (b, c)),   # x tile
            pl.BlockSpec((1, lt), lambda c, b: (0, c)),    # pe tile (reused over batch)
        ],
        out_specs=pl.BlockSpec((bt, lt), lambda c, b: (b, c)),
        compiler_params=pltpu.CompilerParams(
            dimension_semantics=("parallel", "parallel"),
        ),
    )(x2, pe2)
    return out.reshape(B, S, D)


# ---------------------------------------------------------------------------
# Pure-JAX reference mirroring the PyTorch __init__ + forward exactly.
# ---------------------------------------------------------------------------
def positional_encoding_ref(x, max_len=5000):
    B, S, D = x.shape
    position = jnp.arange(0, max_len, dtype=jnp.float32)[:, None]
    div_term = jnp.exp(jnp.arange(0, D, 2, dtype=jnp.float32)
                       * -(math.log(10000.0) / D))
    pe = jnp.zeros((max_len, D), dtype=jnp.float32)
    pe = pe.at[:, 0::2].set(jnp.sin(position * div_term))
    pe = pe.at[:, 1::2].set(jnp.cos(position * div_term))
    return x + pe[None, :S, :]


if __name__ == "__main__":
    # Small shape implied by the module's forward: (batch, seq, d_model).
    key = jax.random.PRNGKey(0)
    B, S, D = 2, 8, 32
    x = jax.random.normal(key, (B, S, D), dtype=jnp.float32)

    out = jax.block_until_ready(positional_encoding(x))
    ref = positional_encoding_ref(x)
    assert out.shape == (B, S, D)
    assert jnp.allclose(out, ref, atol=1e-5, rtol=1e-5), "mismatch vs reference (small)"

    # Second case exercising the tiled multi-block path (grid = (2, 2)).
    B2, S2, D2 = 16, 128, 512
    x2 = jax.random.normal(jax.random.PRNGKey(1), (B2, S2, D2), dtype=jnp.float32)
    out2 = jax.block_until_ready(positional_encoding(x2))
    ref2 = positional_encoding_ref(x2)
    assert jnp.allclose(out2, ref2, atol=1e-5, rtol=1e-5), "mismatch vs reference (tiled)"

    print("KERNEL_OK")
</pallas_src>

<mosaic_0001>
module attributes {stable_mosaic.version = 11 : i64} {
  func.func @_add_pe_kernel(%arg0: i32, %arg1: i32, %arg2: memref<2x256xf32, #tpu.memory_space<vmem>>, %arg3: memref<1x256xf32, #tpu.memory_space<vmem>>, %arg4: memref<2x256xf32, #tpu.memory_space<vmem>>) attributes {dimension_semantics = [#tpu.dimension_semantics<parallel>, #tpu.dimension_semantics<parallel>], iteration_bounds = array<i64: 1, 1>, scalar_prefetch = 0 : i64, scratch_operands = 0 : i64, tpu.core_type = #tpu.core_type<tc>, window_params = [{transform_indices = @transform_0, window_bounds = array<i64: 2, 256>}, {transform_indices = @transform_1, window_bounds = array<i64: 1, 256>}, {transform_indices = @transform_2, window_bounds = array<i64: 2, 256>}]} {
    %c0 = arith.constant 0 : index
    %c0_0 = arith.constant 0 : index
    %0 = vector.load %arg2[%c0, %c0_0] : memref<2x256xf32, #tpu.memory_space<vmem>>, vector<2x256xf32>
    %c0_1 = arith.constant 0 : index
    %c0_2 = arith.constant 0 : index
    %1 = vector.load %arg3[%c0_1, %c0_2] : memref<1x256xf32, #tpu.memory_space<vmem>>, vector<1x256xf32>
    %2 = vector.broadcast %1 : vector<1x256xf32> to vector<2x256xf32>
    %3 = arith.addf %0, %2 : vector<2x256xf32>
    %c0_3 = arith.constant 0 : index
    %c0_4 = arith.constant 0 : index
    %4 = vector.load %arg4[%c0_3, %c0_4] : memref<2x256xf32, #tpu.memory_space<vmem>>, vector<2x256xf32>
    tpu.vector_store %arg4[%c0_3, %c0_4], %3 {strides = array<i32>} : memref<2x256xf32, #tpu.memory_space<vmem>>, vector<2x256xf32>,
    return
  }
  func.func @transform_0(%arg0: i32, %arg1: i32) -> (i32, i32) {
    %c0_i32 = arith.constant 0 : i32
    return %arg1, %arg0 : i32, i32
  }
  func.func @transform_1(%arg0: i32, %arg1: i32) -> (i32, i32) {
    %c0_i32 = arith.constant 0 : i32
    %c0_i32_0 = arith.constant 0 : i32
    return %c0_i32, %arg0 : i32, i32
  }
  func.func @transform_2(%arg0: i32, %arg1: i32) -> (i32, i32) {
    %c0_i32 = arith.constant 0 : i32
    return %arg1, %arg0 : i32, i32
  }
}

</mosaic_0001>

<bundles_post_ra>
// kernel: tpu_custom_call.1
= control target key start
LH: loop header
LB: loop body
LE: loop exit
PB: predicated region body
PF: predicated region fallthrough
CT: control target
= control target key end

     0   :  { %7 = vsyncpa [#allocation3], 0  ;;  %s157_s0 = inlined_call_operand.hbm [shape: f32[2,256], index: 0, kind: input, shape index: {}]   ;;  %s158_s1 = inlined_call_operand.vmem [shape: f32[1,256], index: 1, kind: input, shape index: {}]   ;;  %s159_s2 = inlined_call_operand.hbm [shape: f32[2,256], index: 2, kind: output, shape index: {}]  }
   0x1   :  { %8 = vsyncpa [#allocation4], 0  ;;  %s112_s9 = smov [#allocation2]   ;;  %s64_s13 = scalar_lea.hbm %s157_s0, 64 }
   0x2   :  { %s15_s10 = sshll.u32 %s112_s9, 4  ;;  %p65_p0 = scmp.ne.s32.totalorder %s157_s0, %s64_s13  ;;  %s16_s10 = int_to_ptr.vmem [resolvable:$true] %s15_s10 }
   0x3   :  { %p68_p1 = scmp.lt.u32.totalorder %s64_s13, %s157_s0 }
   0x5   :  { %p70_p2 = pnand %p68_p1, %p65_p0 }
   0x7   :  { %73 = shalt.err (!%p70_p2)
}
   0x8   :  { %s74_s18 = scalar_lea.vmem %s16_s10, 64  ;;  %p79_p4 = scmp.lt.s32.totalorder %s16_s10, %s16_s10 }
   0x9   :  { %p75_p3 = scmp.ne.s32.totalorder %s16_s10, %s74_s18  ;;  %p80_p5 = scmp.lt.s32.totalorder %s74_s18, %s74_s18 }
   0xb   :  { %p81_p6 = por %p80_p5, %p79_p4 }
   0xd   :  { %p82_p7 = pnand %p81_p6, %p75_p3 }
   0xf   :  { %85 = shalt.err (!%p82_p7)
}
  0x10   :  { %18 = dma.hbm_to_vmem [thread:$0]  %s157_s0, 64, %s16_s10, [#allocation3]  }
  0x11   :  { %108 = dma.done.wait [#allocation3], 64  }
  0x12   :  { %109 = vsyncadd [#allocation3], 4294967232  ;;  %v27_v0 = vlaneseq  ;;  %v113_v1 = vmov 1983009808   ;;  %v25_v7 = vld [vmem:[%s158_s1] sm:$0x3] }
  0x13   :  { %v37_v2 = vunpack.c.l.s4 %v113_v1  ;;  %v24_v12 = vld [vmem:[#allocation2] sm:$0xf]  ;;  %s114_s23 = smov [#allocation5]  }
  0x14   :  { %v28_v3 = vshrl.u32 %v27_v0, 7  ;;  %s52_s0 = sshll.u32 %s114_s23, 4  ;;  %s53_s0 = int_to_ptr.vmem [resolvable:$true] %s52_s0 }
  0x15   :  { %v38_v6 = vunpack.c.0.s8 %v37_v2  ;;  %s86_s24 = scalar_lea.vmem %s53_s0, 64  ;;  %p91_p9 = scmp.lt.s32.totalorder %s53_s0, %s53_s0 }
  0x16   :  { %v29_v4 = vsub.s32 0, %v28_v3  ;;  %v33_v5 = vsub.s32 1, %v28_v3  ;;  %p87_p8 = scmp.ne.s32.totalorder %s53_s0, %s86_s24  ;;  %p92_p10 = scmp.lt.s32.totalorder %s86_s24, %s86_s24 }
  0x17   :  { %v41_v10 = vsub.s32 %v38_v6, %v28_v3 }
  0x18   :  { %v30_v8 = vrot.slane %v25_v7, %v29_v4  ;;  %v34_v9 = vrot.slane %v25_v7, %v33_v5  ;;  %p93_p11 = por %p92_p10, %p91_p9 }
  0x1a   :  { %v35_v11 = vcombine.low %v30_v8, %v34_v9  ;;  %p94_p12 = pnand %p93_p11, %p87_p8 }
  0x1c   :  { %v42_v13 = vrot.slane %v35_v11, %v41_v10 }
  0x1e   :  { %v44_v14 = vadd.f32 %v42_v13, %v24_v12 }
  0x20   :  { %45 = vst [vmem:[#allocation5] sm:$0xf] %v44_v14 }
  0x21   :  { %97 = shalt.err (!%p94_p12)
}
  0x22   :  { %s98_s26 = scalar_lea.hbm %s159_s2, 64 }
  0x23   :  { %p99_p13 = scmp.ne.s32.totalorder %s159_s2, %s98_s26  ;;  %p102_p0 = scmp.lt.u32.totalorder %s98_s26, %s159_s2 }
  0x25   :  { %p104_p1 = pnand %p102_p0, %p99_p13 }
  0x27   :  { %107 = shalt.err (!%p104_p1)
}
  0x28   :  { %55 = dma.vmem_to_hbm [thread:$0]  %s53_s0, 64, %s159_s2, [#allocation4]  }
  0x29   :  { %110 = dma.done.wait [#allocation4], 64  }
  0x2a   :  { %111 = vsyncadd [#allocation4], 4294967232 }
  0x2b   :  { %59 = vsyncpa [#allocation3], 1 }
  0x2c   :  { %60 = vsyncpa [#allocation4], 1 }

</bundles_post_ra>
